<compile_context>
chip_gen: v6e
topology: v6e:2x2x1
jax: 0.10.0
libtpu: 0.0.40
codegen_flags: <defaults>
</compile_context>

<pallas_src>
import math

import jax
import jax.numpy as jnp
from jax.experimental import pallas as pl
from jax.experimental.pallas import tpu as pltpu

EPS = 1e-5


def _round_up(x, m):
    return ((x + m - 1) // m) * m


def _round_down(x, m):
    return (x // m) * m


def layernorm_kernel(x_ref, wb_ref, o_ref):
    # x_ref: (tm, C) tile of rows; wb_ref: (2, C) packed [weight; bias] in f32.
    # HBM-bound kernel: all VPU/XLU/EUP work below is hidden under the tile
    # DMAs, so we use the numerically stronger two-pass variance.
    x = x_ref[...].astype(jnp.float32)
    inv_c = jnp.float32(1.0 / x_ref.shape[-1])

    mean = jnp.sum(x, axis=-1, keepdims=True) * inv_c
    xc = x - mean
    var = jnp.sum(xc * xc, axis=-1, keepdims=True) * inv_c
    inv = jax.lax.rsqrt(var + EPS)

    w = wb_ref[0, :]  # already f32; row-broadcast happens in the VPU expression
    b = wb_ref[1, :]
    o_ref[...] = (xc * inv * w + b).astype(o_ref.dtype)


def _vmem_budgets():
    """(per-kernel tile budget, vmem_limit_bytes) derived from the chip's VMEM."""
    try:
        cap = int(pltpu.get_tpu_info().vmem_capacity_bytes)
    except Exception:
        cap = 64 * 1024 * 1024  # conservative: v7x per-TC VMEM
    vmem_limit = int(min(cap // 2, 64 * 1024 * 1024))  # 32 MiB on v7x, 64 MiB on v5e/v6e
    tile_budget = vmem_limit // 2                      # 16 MiB on v7x, 32 MiB elsewhere
    return tile_budget, vmem_limit


def _choose_tm(rows, c, itemsize, tile_budget):
    # Sublane-packing-friendly floor: 8 rows (f32), 16 (bf16), 32 (int8/fp8).
    min_tm = 8 if itemsize >= 4 else (16 if itemsize == 2 else 32)

    # Per-row VMEM cost: double-buffered input + output tiles plus ~16 B/elem
    # of live f32 working set (x_f32, xc, y) not covered by BlockSpec buffers.
    bytes_per_row = c * (4 * itemsize + 16)
    tm_cap = max(min_tm, min(int(tile_budget // bytes_per_row), 512))
    tm_cap = _round_down(tm_cap, min_tm) or min_tm

    # Prefer >= 16 total grid steps (>= 8 per v7x TensorCore; also enough steps
    # on single-TC v5e/v6e for the double buffer to hide first/last DMAs)...
    tm = min(tm_cap, max(min_tm, _round_down(rows // 16, min_tm)))

    # ...but keep >= ~4 MiB of HBM traffic per step so the ~0.35 us fixed
    # per-step cost stays a small fraction of each step.
    traffic_floor = _round_up(pl.cdiv(4 << 20, 2 * c * itemsize), min_tm)
    tm = max(tm, min(traffic_floor, tm_cap))

    # Never larger than the (sublane-rounded) row count.
    tm = min(tm, _round_up(rows, min_tm))
    return int(max(tm, min_tm))


def layer_norm(x, weight, bias=None, *, tm=None):
    """LayerNorm over the last dim of x. x: (..., C); weight/bias: (C,). eps=1e-5."""
    orig_shape = x.shape
    C = orig_shape[-1]
    rows = int(math.prod(orig_shape[:-1]))
    dtype = x.dtype
    itemsize = jnp.dtype(dtype).itemsize

    tile_budget, vmem_limit = _vmem_budgets()
    if tm is None:
        tm = _choose_tm(rows, C, itemsize, tile_budget)

    # No HBM-level padding of rows or C (see header comment).
    x2 = x.reshape(rows, C)

    # Pack weight & bias into one resident (2, C) f32 operand (single DMA,
    # parameter precision preserved — the kernel computes in f32 anyway).
    if bias is None:
        bias = jnp.zeros((C,), jnp.float32)
    wb = jnp.stack([weight.astype(jnp.float32), bias.astype(jnp.float32)], axis=0)

    grid = (pl.cdiv(rows, tm),)

    cost = pl.CostEstimate(
        flops=7 * rows * C,
        transcendentals=rows,  # one rsqrt per row
        bytes_accessed=2 * rows * C * itemsize + 2 * C * 4,
    )

    out = pl.pallas_call(
        layernorm_kernel,
        out_shape=jax.ShapeDtypeStruct((rows, C), dtype),
        grid_spec=pltpu.PrefetchScalarGridSpec(
            num_scalar_prefetch=0,
            grid=grid,
            in_specs=[
                pl.BlockSpec((tm, C), lambda i: (i, 0)),
                pl.BlockSpec((2, C), lambda i: (0, 0)),  # resident across steps
            ],
            out_specs=pl.BlockSpec((tm, C), lambda i: (i, 0)),
        ),
        compiler_params=pltpu.CompilerParams(
            dimension_semantics=("parallel",),
            vmem_limit_bytes=vmem_limit,
        ),
        cost_estimate=cost,
    )(x2, wb)

    return out.reshape(orig_shape)


if __name__ == "__main__":
    B, T, C = 2, 8, 32  # small demo shapes: batch=2, seq=8, hidden=32

    key = jax.random.PRNGKey(0)
    kx, kw, kb = jax.random.split(key, 3)
    x = jax.random.normal(kx, (B, T, C), dtype=jnp.float32)

    # Parameters as in LayerNorm.__init__ (ndim=C, bias=True); perturbed so the
    # affine part of the kernel is actually exercised by the check below.
    weight = jnp.ones((C,), dtype=jnp.float32) + 0.1 * jax.random.normal(kw, (C,), jnp.float32)
    bias = 0.1 * jax.random.normal(kb, (C,), dtype=jnp.float32)

    y = layer_norm(x, weight, bias)
    jax.block_until_ready(y)

    # Lightweight sanity check against pure-JAX reference.
    mean = jnp.mean(x, axis=-1, keepdims=True)
    var = jnp.mean((x - mean) ** 2, axis=-1, keepdims=True)
    ref = (x - mean) * jax.lax.rsqrt(var + EPS) * weight + bias
    assert jnp.max(jnp.abs(y - ref)) < 1e-5

    print("KERNEL_OK")
</pallas_src>

<mosaic_0001>
module attributes {stable_mosaic.version = 11 : i64} {
  func.func @layernorm_kernel(%arg0: i32, %arg1: memref<16x32xf32, #tpu.memory_space<vmem>>, %arg2: memref<2x32xf32, #tpu.memory_space<vmem>>, %arg3: memref<16x32xf32, #tpu.memory_space<vmem>>) attributes {dimension_semantics = [#tpu.dimension_semantics<parallel>], iteration_bounds = array<i64: 1>, scalar_prefetch = 0 : i64, scratch_operands = 0 : i64, tpu.core_type = #tpu.core_type<tc>, window_params = [{transform_indices = @transform_0, window_bounds = array<i64: 16, 32>}, {pipeline_mode = #tpu.pipeline_mode<synchronous>, transform_indices = @transform_1, window_bounds = array<i64: 2, 32>}, {transform_indices = @transform_2, window_bounds = array<i64: 16, 32>}]} {
    %c0 = arith.constant 0 : index
    %c0_0 = arith.constant 0 : index
    %0 = vector.load %arg1[%c0, %c0_0] : memref<16x32xf32, #tpu.memory_space<vmem>>, vector<16x32xf32>
    %cst = arith.constant dense<0.000000e+00> : vector<16xf32>
    %1 = vector.multi_reduction <add>, %0, %cst [1] : vector<16x32xf32> to vector<16xf32>
    %2 = vector.shape_cast %1 : vector<16xf32> to vector<16x1xf32>
    %cst_1 = arith.constant 3.125000e-02 : f32
    %3 = vector.broadcast %cst_1 : f32 to vector<16x1xf32>
    %4 = arith.mulf %2, %3 : vector<16x1xf32>
    %5 = vector.broadcast %4 : vector<16x1xf32> to vector<16x32xf32>
    %6 = arith.subf %0, %5 : vector<16x32xf32>
    %7 = arith.mulf %6, %6 : vector<16x32xf32>
    %cst_2 = arith.constant dense<0.000000e+00> : vector<16xf32>
    %8 = vector.multi_reduction <add>, %7, %cst_2 [1] : vector<16x32xf32> to vector<16xf32>
    %9 = vector.shape_cast %8 : vector<16xf32> to vector<16x1xf32>
    %cst_3 = arith.constant 3.125000e-02 : f32
    %10 = vector.broadcast %cst_3 : f32 to vector<16x1xf32>
    %11 = arith.mulf %9, %10 : vector<16x1xf32>
    %cst_4 = arith.constant 9.99999974E-6 : f32
    %12 = vector.broadcast %cst_4 : f32 to vector<16x1xf32>
    %13 = arith.addf %11, %12 : vector<16x1xf32>
    %14 = math.rsqrt %13 : vector<16x1xf32>
    %c0_5 = arith.constant 0 : index
    %c0_6 = arith.constant 0 : index
    %15 = vector.load %arg2[%c0_5, %c0_6] : memref<2x32xf32, #tpu.memory_space<vmem>>, vector<1x32xf32>
    %16 = vector.shape_cast %15 : vector<1x32xf32> to vector<32xf32>
    %c1 = arith.constant 1 : index
    %c0_7 = arith.constant 0 : index
    %17 = vector.load %arg2[%c1, %c0_7] : memref<2x32xf32, #tpu.memory_space<vmem>>, vector<1x32xf32>
    %18 = vector.shape_cast %17 : vector<1x32xf32> to vector<32xf32>
    %19 = vector.broadcast %14 : vector<16x1xf32> to vector<16x32xf32>
    %20 = arith.mulf %6, %19 : vector<16x32xf32>
    %21 = vector.shape_cast %16 : vector<32xf32> to vector<1x32xf32>
    %22 = vector.broadcast %21 : vector<1x32xf32> to vector<16x32xf32>
    %23 = arith.mulf %20, %22 : vector<16x32xf32>
    %24 = vector.shape_cast %18 : vector<32xf32> to vector<1x32xf32>
    %25 = vector.broadcast %24 : vector<1x32xf32> to vector<16x32xf32>
    %26 = arith.addf %23, %25 : vector<16x32xf32>
    %c0_8 = arith.constant 0 : index
    %c0_9 = arith.constant 0 : index
    %27 = vector.load %arg3[%c0_8, %c0_9] : memref<16x32xf32, #tpu.memory_space<vmem>>, vector<16x32xf32>
    tpu.vector_store %arg3[%c0_8, %c0_9], %26 {strides = array<i32>} : memref<16x32xf32, #tpu.memory_space<vmem>>, vector<16x32xf32>,
    return
  }
  func.func @transform_0(%arg0: i32) -> (i32, i32) {
    %c0_i32 = arith.constant 0 : i32
    %c0_i32_0 = arith.constant 0 : i32
    return %arg0, %c0_i32 : i32, i32
  }
  func.func @transform_1(%arg0: i32) -> (i32, i32) {
    %c0_i32 = arith.constant 0 : i32
    %c0_i32_0 = arith.constant 0 : i32
    %c0_i32_1 = arith.constant 0 : i32
    return %c0_i32, %c0_i32_0 : i32, i32
  }
  func.func @transform_2(%arg0: i32) -> (i32, i32) {
    %c0_i32 = arith.constant 0 : i32
    %c0_i32_0 = arith.constant 0 : i32
    return %arg0, %c0_i32 : i32, i32
  }
}

</mosaic_0001>

<bundles_post_ra>
// kernel: tpu_custom_call.1
= control target key start
LH: loop header
LB: loop body
LE: loop exit
PB: predicated region body
PF: predicated region fallthrough
CT: control target
= control target key end

     0   :  { %7 = vsyncpa [#allocation3], 0  ;;  %s219_s0 = inlined_call_operand.hbm [shape: f32[16,32], index: 0, kind: input, shape index: {}]   ;;  %s220_s1 = inlined_call_operand.hbm [shape: f32[2,32], index: 1, kind: input, shape index: {}]   ;;  %s221_s2 = inlined_call_operand.hbm [shape: f32[16,32], index: 2, kind: output, shape index: {}]  }
   0x1   :  { %8 = vsyncpa [#allocation6], 0 }
   0x2   :  { %9 = vsyncpa [#allocation4], 0  ;;  %s178_s9 = smov [#allocation2]  }
   0x3   :  { %s15_s10 = sshll.u32 %s178_s9, 4  ;;  %s16_s10 = int_to_ptr.vmem [resolvable:$true] %s15_s10 }
   0x4   :  { %s120_s11 = scalar_lea.vmem %s16_s10, 256  ;;  %p125_p1 = scmp.lt.s32.totalorder %s16_s10, %s16_s10 }
   0x5   :  { %p121_p0 = scmp.ne.s32.totalorder %s16_s10, %s120_s11  ;;  %p126_p2 = scmp.lt.s32.totalorder %s120_s11, %s120_s11 }
   0x7   :  { %p127_p3 = por %p126_p2, %p125_p1 }
   0x9   :  { %p128_p4 = pnand %p127_p3, %p121_p0 }
   0xb   :  { %131 = shalt.err (!%p128_p4)
}
   0xc   :  { %s179_s12 = smov 128   ;;  %s180_s13 = smov 8  }
   0xd   :  { %21 = dma.hbm_to_vmem [thread:$0]  %s219_s0, 256, %s16_s10, [#allocation3], %s179_s12, %s179_s12, %s180_s13  }
   0xe   :  { %s181_s16 = smov [#allocation5]  }
   0xf   :  { %s28_s17 = sshll.u32 %s181_s16, 4  ;;  %s29_s17 = int_to_ptr.vmem [resolvable:$true] %s28_s17 }
  0x10   :  { %s140_s18 = scalar_lea.vmem %s29_s17, 32  ;;  %p145_p6 = scmp.lt.s32.totalorder %s29_s17, %s29_s17 }
  0x11   :  { %p141_p5 = scmp.ne.s32.totalorder %s29_s17, %s140_s18  ;;  %p146_p7 = scmp.lt.s32.totalorder %s140_s18, %s140_s18 }
  0x13   :  { %p147_p8 = por %p146_p7, %p145_p6 }
  0x15   :  { %p148_p9 = pnand %p147_p8, %p141_p5 }
  0x17   :  { %151 = shalt.err (!%p148_p9)
}
  0x18   :  { %31 = dma.hbm_to_vmem [thread:$0]  %s220_s1, 32, %s29_s17, [#allocation6]  }
  0x19   :  { %172 = dma.done.wait [#allocation3], 256  }
  0x1a   :  { %173 = vsyncadd [#allocation3], 4294967040 }
  0x1b   :  { %174 = dma.done.wait [#allocation6], 32  }
  0x1c   :  { %175 = vsyncadd [#allocation6], 4294967264  ;;  %vm40_vm0 = vcmask 261120   ;;  %v38_v0 = vld [vmem:[#allocation2] sm:$0xff]  ;;  %v39_v1 = vld [vmem:[#allocation2 + $0x8] sm:$0xff]  ;;  %s182_s0 = smov [#allocation7]  }
  0x1d   :  { %v41_v2 = vsel %vm40_vm0, %v38_v0, 0.0  ;;  %v44_v3 = vsel %vm40_vm0, %v39_v1, 0.0  ;;  %v101_v21 = vld [vmem:[#allocation5] ss:$0 sm:$0xff]  ;;  %v102_v23 = vld [vmem:[#allocation5 + $0x1] ss:$0 sm:$0xff] }
  0x1e   :  { %42 = vadd.xlane.f32.xlu0 %v41_v2  ;;  %s88_s1 = sshll.u32 %s182_s0, 4  ;;  %s89_s1 = int_to_ptr.vmem [resolvable:$true] %s88_s1 }
  0x1f   :  { %s152_s21 = scalar_lea.vmem %s89_s1, 256  ;;  %p157_p11 = scmp.lt.s32.totalorder %s89_s1, %s89_s1 }
  0x20   :  { %p153_p10 = scmp.ne.s32.totalorder %s89_s1, %s152_s21  ;;  %p158_p12 = scmp.lt.s32.totalorder %s152_s21, %s152_s21 }
  0x22   :  { %45 = vadd.xlane.f32.xlu0 %v44_v3  ;;  %p159_p13 = por %p158_p12, %p157_p11 }
  0x24   :  { %p160_p0 = pnand %p159_p13, %p153_p10 }
  0xa7   :  { %v43_v4 = vpop.xlane.xlu0 %42 }
  0xa8   :  { %v47_v5 = vmul.f32 0.03125, %v43_v4 }
  0xaa   :  { %v49_v6 = vsub.f32 %v38_v0, %v47_v5 }
  0xab   :  { %v46_v7 = vpop.xlane.xlu0 %45 }
  0xac   :  { %v48_v8 = vmul.f32 0.03125, %v46_v7  ;;  %v51_v9 = vmul.f32 %v49_v6, %v49_v6 }
  0xae   :  { %v50_v10 = vsub.f32 %v39_v1, %v48_v8  ;;  %v53_v11 = vsel %vm40_vm0, %v51_v9, 0.0 }
  0xaf   :  { %54 = vadd.xlane.f32.xlu1 %v53_v11 }
  0xb0   :  { %v52_v12 = vmul.f32 %v50_v10, %v50_v10 }
  0xb2   :  { %v56_v13 = vsel %vm40_vm0, %v52_v12, 0.0 }
  0xb3   :  { %57 = vadd.xlane.f32.xlu1 %v56_v13 }
 0x138   :  { %v55_v14 = vpop.xlane.xlu1 %54 }
 0x139   :  { %v59_v15 = vmul.f32 0.03125, %v55_v14 }
 0x13b   :  { %v61_v16 = vadd.f32 1e-05, %v59_v15 }
 0x13c   :  { %v58_v17 = vpop.xlane.xlu1 %57 }
 0x13d   :  { %108 = vrsqrt.f32 %v61_v16  ;;  %v60_v18 = vmul.f32 0.03125, %v58_v17 }
 0x13f   :  { %v62_v19 = vadd.f32 1e-05, %v60_v18 }
 0x141   :  { %110 = vrsqrt.f32 %v62_v19 }
 0x14a   :  { %v109_v20 = vpop.eup %108 }
 0x14b   :  { %v67_v22 = vmul.f32 %v109_v20, %v49_v6 }
 0x14d   :  { %v73_v24 = vmul.f32 %v101_v21, %v67_v22 }
 0x14e   :  { %v111_v25 = vpop.eup %110 }
 0x14f   :  { %v68_v26 = vmul.f32 %v111_v25, %v50_v10  ;;  %v79_v27 = vadd.f32 %v102_v23, %v73_v24 }
 0x151   :  { %v74_v28 = vmul.f32 %v101_v21, %v68_v26  ;;  %81 = vst.msk [vmem:[#allocation7] sm:$0xff] %vm40_vm0, %v79_v27 }
 0x153   :  { %v80_v29 = vadd.f32 %v102_v23, %v74_v28 }
 0x155   :  { %82 = vst.msk [vmem:[#allocation7 + $0x8] sm:$0xff] %vm40_vm0, %v80_v29 }
 0x156   :  { %163 = shalt.err (!%p160_p0)
}
 0x157   :  { %94 = dma.vmem_to_hbm [thread:$0]  %s89_s1, 256, %s221_s2, [#allocation4], %s179_s12, %s179_s12, %s180_s13  }
 0x158   :  { %176 = dma.done.wait [#allocation4], 256  }
 0x159   :  { %177 = vsyncadd [#allocation4], 4294967040 }
 0x15a   :  { %98 = vsyncpa [#allocation3], 1 }
 0x15b   :  { %99 = vsyncpa [#allocation6], 1 }
 0x15c   :  { %100 = vsyncpa [#allocation4], 1 }

</bundles_post_ra>
